<compile_context>
chip_gen: v5e
topology: v5e:2x2
jax: 0.10.0
libtpu: 0.0.40
codegen_flags: <defaults>
</compile_context>

<pallas_src>
import functools

import jax
import jax.numpy as jnp
from jax.experimental import pallas as pl
from jax.experimental.pallas import tpu as pltpu

_MXU_DTYPE = jnp.bfloat16
_LN_EPS = 1e-5


def _round_up(a: int, b: int) -> int:
    return ((a + b - 1) // b) * b


def _vmem_budget_bytes() -> int:
    """Usable VMEM budget: device capacity minus headroom (v7x-safe)."""
    try:
        cap = int(pltpu.get_tpu_info().vmem_capacity_bytes)
    except Exception:
        cap = 64 * 2**20          # conservative fallback (v7x per-core VMEM)
    return max(32 * 2**20, cap - 8 * 2**20)


def prepare_ffn_params(w1, b1, w2, b2, gamma, beta, *, mxu_dtype=_MXU_DTYPE):
    """Pad to lane-dense (x128) shapes and cast weights to the MXU dtype.

    Call ONCE at model load; ffn_layer_prepared consumes the padded copies, so
    the per-forward wrapper never re-reads/re-writes the weights.
    """
    D, F = w1.shape
    assert w2.shape == (F, D)
    Dp, Fp = _round_up(D, 128), _round_up(F, 128)
    f32 = jnp.float32
    return {
        "w1": jnp.pad(w1.astype(mxu_dtype), ((0, Dp - D), (0, Fp - F))),
        "b1": jnp.pad(b1.astype(f32), (0, Fp - F)).reshape(1, Fp),
        "w2": jnp.pad(w2.astype(mxu_dtype), ((0, Fp - F), (0, Dp - D))),
        "b2": jnp.pad(b2.astype(f32), (0, Dp - D)).reshape(1, Dp),
        "gamma": jnp.pad(gamma.astype(f32), (0, Dp - D)).reshape(1, Dp),
        "beta": jnp.pad(beta.astype(f32), (0, Dp - D)).reshape(1, Dp),
    }


def _make_ffn_kernel(d_model: int, d_model_pad: int):
    """Kernel body; true d_model is static (closed over)."""
    need_mask = d_model_pad != d_model
    inv_d = 1.0 / float(d_model)

    def ffn_kernel(x_ref, w1_ref, b1_ref, w2_ref, b2_ref, g_ref, beta_ref,
                   o_ref, acc_ref):
        f = pl.program_id(1)

        @pl.when(f == 0)
        def _init():
            acc_ref[...] = jnp.zeros_like(acc_ref)

        # linear1 chunk (+bias, ReLU): bf16 MXU operands, f32 accumulation.
        xm = x_ref[...].astype(w1_ref.dtype)                         # [tm, Dp]
        h = jnp.dot(xm, w1_ref[...], preferred_element_type=jnp.float32)
        h = jnp.maximum(h + b1_ref[...], 0.0)                        # [tm, tF]

        # Partial linear2, accumulated over the F chunks (f32 accumulator).
        acc_ref[...] += jnp.dot(h.astype(w2_ref.dtype), w2_ref[...],
                                preferred_element_type=jnp.float32)  # [tm, Dp]

        @pl.when(f == pl.num_programs(1) - 1)
        def _finalize():
            # dropout(p=0.0) and ls1=Identity are no-ops.
            x = x_ref[...].astype(jnp.float32)
            z = x + acc_ref[...] + b2_ref[...]
            # LayerNorm over the true d_model columns (padded cols are zero).
            mean = jnp.sum(z, axis=-1, keepdims=True) * inv_d
            zc = z - mean
            if need_mask:
                col = jax.lax.broadcasted_iota(jnp.int32, zc.shape, 1)
                zc = jnp.where(col < d_model, zc, 0.0)
            var = jnp.sum(zc * zc, axis=-1, keepdims=True) * inv_d
            zn = zc * jax.lax.rsqrt(var + _LN_EPS)
            o_ref[...] = (zn * g_ref[...] + beta_ref[...]).astype(o_ref.dtype)

    return ffn_kernel


@functools.partial(
    jax.jit, static_argnames=("block_rows", "f_chunk", "single_buffer"))
def _ffn_impl(x, w1_p, b1_p, w2_p, b2_p, g_p, be_p, *,
              block_rows=512, f_chunk=None, single_buffer=True):
    orig_shape = x.shape
    D = orig_shape[-1]
    Dp, Fp = w1_p.shape
    assert Dp == _round_up(D, 128) and w2_p.shape == (Fp, Dp)

    xf = x.reshape(-1, D)                       # keep native dtype for the DMA
    N = xf.shape[0]
    x_item = jnp.dtype(x.dtype).itemsize

    budget = _vmem_budget_bytes()

    def tile_bytes(tm, tF, nbuf_w):
        w = 2 * Dp * tF * 2 * nbuf_w            # w1 + w2 chunks (bf16)
        vec = tF * 4 * nbuf_w + 3 * Dp * 4      # b1 chunk + b2/gamma/beta
        io = 2 * tm * Dp * 2 * x_item           # x + out tiles, 2 buffers each
        acc = tm * Dp * 4                       # f32 accumulator scratch
        live = tm * tF * 4 + 2 * tm * Dp * 4    # h chunk + live f32 temps
        return w + vec + io + acc + live

    # ---- F-axis chunking: bounded weight residency / h intermediate --------
    tm_probe = min(256, max(8, _round_up(N, 8)))
    if f_chunk is not None:
        assert Fp % f_chunk == 0 and f_chunk % 128 == 0
        tF = int(f_chunk)
        nbuf_w = 1 if tF == Fp else 2
    elif tile_bytes(tm_probe, Fp, 1) <= 0.7 * budget:
        tF, nbuf_w = Fp, 1                      # full F resident, single-buffer
    else:
        nbuf_w = 2                              # stream F chunks, double-buffer
        tF = 128
        for t in range(Fp - 128, 0, -128):      # largest x128 divisor that fits
            if Fp % t == 0 and tile_bytes(tm_probe, t, 2) <= 0.7 * budget:
                tF = t
                break
    n_f = Fp // tF

    # ---- row tile: as large as the budget allows, >=4 steps when possible --
    tm = max(8, min(_round_up(block_rows, 8), _round_up(N, 8)))
    while tm > 8 and tile_bytes(tm, tF, nbuf_w) > 0.85 * budget:
        tm = max(8, _round_up(tm // 2, 8))
    min_steps = 4                               # v7x: >=2 grid steps per core
    if N >= min_steps * 8:
        tm = min(tm, max(8, _round_up(-(-N // min_steps), 8)))
    Np = _round_up(N, tm)

    xf_p = jnp.pad(xf, ((0, Np - N), (0, Dp - D)))

    single = single_buffer and hasattr(pl, "Buffered")

    def spec(shape, imap, invariant):
        if invariant and single:
            return pl.BlockSpec(shape, imap, pipeline_mode=pl.Buffered(1))
        return pl.BlockSpec(shape, imap)

    in_specs = [
        pl.BlockSpec((tm, Dp), lambda i, f: (i, 0)),            # x row tile
        spec((Dp, tF), lambda i, f: (0, f), n_f == 1),          # w1 chunk
        spec((1, tF), lambda i, f: (0, f), n_f == 1),           # b1 chunk
        spec((tF, Dp), lambda i, f: (f, 0), n_f == 1),          # w2 chunk
        spec((1, Dp), lambda i, f: (0, 0), True),               # b2
        spec((1, Dp), lambda i, f: (0, 0), True),               # ln gamma
        spec((1, Dp), lambda i, f: (0, 0), True),               # ln beta
    ]

    vmem_limit = int(min(budget,
                         max(32 * 2**20,
                             int(1.3 * tile_bytes(tm, tF, nbuf_w)))))

    cost = pl.CostEstimate(
        flops=4 * Np * Dp * Fp,                                  # two matmuls
        transcendentals=0,
        bytes_accessed=(2 * Np * Dp * x_item                     # x in + out
                        + 2 * Dp * Fp * 2 + (Fp + 3 * Dp) * 4),  # params
    )

    out = pl.pallas_call(
        _make_ffn_kernel(D, Dp),
        out_shape=jax.ShapeDtypeStruct((Np, Dp), x.dtype),
        grid_spec=pltpu.PrefetchScalarGridSpec(
            num_scalar_prefetch=0,
            grid=(Np // tm, n_f),
            in_specs=in_specs,
            out_specs=pl.BlockSpec((tm, Dp), lambda i, f: (i, 0)),
            scratch_shapes=[pltpu.VMEM((tm, Dp), jnp.float32)],
        ),
        compiler_params=pltpu.CompilerParams(
            dimension_semantics=("parallel", "arbitrary"),
            vmem_limit_bytes=vmem_limit,
        ),
        cost_estimate=cost,
    )(xf_p, w1_p, b1_p, w2_p, b2_p, g_p, be_p)

    return out[:N, :D].reshape(orig_shape)


def ffn_layer_prepared(x, params, *, block_rows=512, f_chunk=None):
    """FFNLayer.forward_post with pre-padded / pre-cast params."""
    args = (x, params["w1"], params["b1"], params["w2"], params["b2"],
            params["gamma"], params["beta"])
    try:
        return _ffn_impl(*args, block_rows=block_rows, f_chunk=f_chunk,
                         single_buffer=True)
    except Exception:
        # Fallback for jax versions rejecting pl.Buffered(1) single-buffering.
        return _ffn_impl(*args, block_rows=block_rows, f_chunk=f_chunk,
                         single_buffer=False)


def ffn_layer(x, w1, b1, w2, b2, gamma, beta, *, block_rows=512, f_chunk=None):
    """Convenience wrapper (pads/casts params every call).

    Production code should call prepare_ffn_params once at model load and use
    ffn_layer_prepared.
    """
    params = prepare_ffn_params(w1, b1, w2, b2, gamma, beta)
    return ffn_layer_prepared(x, params, block_rows=block_rows,
                              f_chunk=f_chunk)


# ----------------------------------------------------------------------------
# Reference + tests
# ----------------------------------------------------------------------------
def xavier_uniform(key, shape, dtype=jnp.float32):
    fan_in, fan_out = shape[0], shape[1]
    bound = jnp.sqrt(6.0 / (fan_in + fan_out))
    return jax.random.uniform(key, shape, dtype, -bound, bound)


def _ref_ffn(x, w1, b1, w2, b2, gamma, beta, *, mxu_dtype=None):
    """Pure-JAX reference. mxu_dtype=bf16 mirrors the kernel's MXU math."""
    x = x.astype(jnp.float32)
    if mxu_dtype is not None:
        h = jnp.dot(x.astype(mxu_dtype), w1.astype(mxu_dtype),
                    preferred_element_type=jnp.float32) + b1
        h = jnp.maximum(h, 0.0)
        y = jnp.dot(h.astype(mxu_dtype), w2.astype(mxu_dtype),
                    preferred_element_type=jnp.float32) + b2
    else:
        h = jnp.maximum(x @ w1 + b1, 0.0)
        y = h @ w2 + b2
    z = x + y
    mean = jnp.mean(z, axis=-1, keepdims=True)
    var = jnp.mean((z - mean) ** 2, axis=-1, keepdims=True)
    return (z - mean) * jax.lax.rsqrt(var + _LN_EPS) * gamma + beta


if __name__ == "__main__":
    key = jax.random.PRNGKey(0)
    (kx, kw1, kb1, kw2, kb2, kx2,
     kx3, kw3, kw4, kg3, kb3) = jax.random.split(key, 11)

    # ---- Test 1: module-consistent small shapes -----------------------------
    # tgt: (seq, batch, d_model) = (8, 2, 32), dim_feedforward = 64.
    seq, batch, d_model, dim_ff = 8, 2, 32, 64
    x = jax.random.normal(kx, (seq, batch, d_model), jnp.float32)
    w1 = xavier_uniform(kw1, (d_model, dim_ff))               # linear1.weight.T
    b1 = jax.random.uniform(kb1, (dim_ff,), jnp.float32,
                            -1.0 / jnp.sqrt(d_model), 1.0 / jnp.sqrt(d_model))
    w2 = xavier_uniform(kw2, (dim_ff, d_model))               # linear2.weight.T
    b2 = jax.random.uniform(kb2, (d_model,), jnp.float32,
                            -1.0 / jnp.sqrt(dim_ff), 1.0 / jnp.sqrt(dim_ff))
    gamma = jnp.ones((d_model,), jnp.float32)
    beta = jnp.zeros((d_model,), jnp.float32)

    params = prepare_ffn_params(w1, b1, w2, b2, gamma, beta)
    out = jax.block_until_ready(ffn_layer_prepared(x, params))
    assert out.shape == x.shape
    ref_bf16 = _ref_ffn(x, w1, b1, w2, b2, gamma, beta, mxu_dtype=jnp.bfloat16)
    assert jnp.allclose(out, ref_bf16, atol=5e-3, rtol=5e-3)
    ref_f32 = _ref_ffn(x, w1, b1, w2, b2, gamma, beta)
    assert jnp.allclose(out, ref_f32, atol=5e-2, rtol=5e-2)

    # ---- Test 2: ragged row count (padding + multi-step parallel grid) ------
    x2 = jax.random.normal(kx2, (9, 3, d_model), jnp.float32)   # N = 27 rows
    out2 = jax.block_until_ready(
        ffn_layer_prepared(x2, params, block_rows=16))
    ref2 = _ref_ffn(x2, w1, b1, w2, b2, gamma, beta, mxu_dtype=jnp.bfloat16)
    assert out2.shape == x2.shape
    assert jnp.allclose(out2, ref2, atol=5e-3, rtol=5e-3)

    # ---- Test 3: forced F-chunk streaming path (Fc=2) + multi row tiles -----
    d3, f3 = 256, 512
    x3 = jax.random.normal(kx3, (16, 4, d3), jnp.float32)       # N = 64 rows
    w3 = xavier_uniform(kw3, (d3, f3))
    w4 = xavier_uniform(kw4, (f3, d3))
    b3 = jnp.zeros((f3,), jnp.float32)
    b4 = jnp.zeros((d3,), jnp.float32)
    g3 = 1.0 + 0.05 * jax.random.normal(kg3, (d3,), jnp.float32)
    be3 = 0.05 * jax.random.normal(kb3, (d3,), jnp.float32)
    out3 = jax.block_until_ready(
        ffn_layer(x3, w3, b3, w4, b4, g3, be3, block_rows=16, f_chunk=256))
    ref3 = _ref_ffn(x3, w3, b3, w4, b4, g3, be3, mxu_dtype=jnp.bfloat16)
    assert out3.shape == x3.shape
    assert jnp.allclose(out3, ref3, atol=1e-2, rtol=1e-2)

    print("KERNEL_OK")
</pallas_src>

<mosaic_0001>
module attributes {stable_mosaic.version = 11 : i64} {
  func.func @ffn_kernel(%arg0: i32, %arg1: i32, %arg2: memref<16x128xf32, #tpu.memory_space<vmem>>, %arg3: memref<128x128xbf16, #tpu.memory_space<vmem>>, %arg4: memref<1x128xf32, #tpu.memory_space<vmem>>, %arg5: memref<128x128xbf16, #tpu.memory_space<vmem>>, %arg6: memref<1x128xf32, #tpu.memory_space<vmem>>, %arg7: memref<1x128xf32, #tpu.memory_space<vmem>>, %arg8: memref<1x128xf32, #tpu.memory_space<vmem>>, %arg9: memref<16x128xf32, #tpu.memory_space<vmem>>, %arg10: memref<16x128xf32, #tpu.memory_space<vmem>>) attributes {dimension_semantics = [#tpu.dimension_semantics<parallel>, #tpu.dimension_semantics<arbitrary>], iteration_bounds = array<i64: 1, 1>, scalar_prefetch = 0 : i64, scratch_operands = 1 : i64, tpu.core_type = #tpu.core_type<tc>, window_params = [{transform_indices = @transform_0, window_bounds = array<i64: 16, 128>}, {pipeline_mode = #tpu.pipeline_mode<synchronous>, transform_indices = @transform_1, window_bounds = array<i64: 128, 128>}, {pipeline_mode = #tpu.pipeline_mode<synchronous>, transform_indices = @transform_2, window_bounds = array<i64: 1, 128>}, {pipeline_mode = #tpu.pipeline_mode<synchronous>, transform_indices = @transform_3, window_bounds = array<i64: 128, 128>}, {pipeline_mode = #tpu.pipeline_mode<synchronous>, transform_indices = @transform_4, window_bounds = array<i64: 1, 128>}, {pipeline_mode = #tpu.pipeline_mode<synchronous>, transform_indices = @transform_5, window_bounds = array<i64: 1, 128>}, {pipeline_mode = #tpu.pipeline_mode<synchronous>, transform_indices = @transform_6, window_bounds = array<i64: 1, 128>}, {transform_indices = @transform_7, window_bounds = array<i64: 16, 128>}]} {
    %c0_i32 = arith.constant 0 : i32
    %0 = arith.cmpi eq, %arg1, %c0_i32 : i32
    %1 = arith.extui %0 : i1 to i32
    %c0_i32_0 = arith.constant 0 : i32
    %2 = arith.cmpi ne, %1, %c0_i32_0 : i32
    scf.if %2 {
      %cst_16 = arith.constant 0.000000e+00 : f32
      %21 = vector.broadcast %cst_16 : f32 to vector<16x128xf32>
      %c0_17 = arith.constant 0 : index
      %c0_18 = arith.constant 0 : index
      %22 = vector.load %arg10[%c0_17, %c0_18] : memref<16x128xf32, #tpu.memory_space<vmem>>, vector<16x128xf32>
      tpu.vector_store %arg10[%c0_17, %c0_18], %21 {strides = array<i32>} : memref<16x128xf32, #tpu.memory_space<vmem>>, vector<16x128xf32>,
    } else {
    }
    %c0 = arith.constant 0 : index
    %c0_1 = arith.constant 0 : index
    %3 = vector.load %arg2[%c0, %c0_1] : memref<16x128xf32, #tpu.memory_space<vmem>>, vector<16x128xf32>
    %4 = arith.truncf %3 : vector<16x128xf32> to vector<16x128xbf16>
    %c0_2 = arith.constant 0 : index
    %c0_3 = arith.constant 0 : index
    %5 = vector.load %arg3[%c0_2, %c0_3] : memref<128x128xbf16, #tpu.memory_space<vmem>>, vector<128x128xbf16>
    %cst = arith.constant dense<0.000000e+00> : vector<16x128xf32>
    %6 = tpu.matmul %4, %5, %cst {dimension_numbers = #tpu.dot_dimension_numbers<[1], [0], [0], [1], [0, 0, 1, 1], [], []>} : vector<16x128xbf16>, vector<128x128xbf16>, vector<16x128xf32> -> vector<16x128xf32>
    %c0_4 = arith.constant 0 : index
    %c0_5 = arith.constant 0 : index
    %7 = vector.load %arg4[%c0_4, %c0_5] : memref<1x128xf32, #tpu.memory_space<vmem>>, vector<1x128xf32>
    %8 = vector.broadcast %7 : vector<1x128xf32> to vector<16x128xf32>
    %9 = arith.addf %6, %8 : vector<16x128xf32>
    %cst_6 = arith.constant 0.000000e+00 : f32
    %10 = vector.broadcast %cst_6 : f32 to vector<16x128xf32>
    %11 = arith.maximumf %9, %10 : vector<16x128xf32>
    %c0_7 = arith.constant 0 : index
    %c0_8 = arith.constant 0 : index
    %12 = vector.load %arg10[%c0_7, %c0_8] : memref<16x128xf32, #tpu.memory_space<vmem>>, vector<16x128xf32>
    %13 = arith.truncf %11 : vector<16x128xf32> to vector<16x128xbf16>
    %c0_9 = arith.constant 0 : index
    %c0_10 = arith.constant 0 : index
    %14 = vector.load %arg5[%c0_9, %c0_10] : memref<128x128xbf16, #tpu.memory_space<vmem>>, vector<128x128xbf16>
    %cst_11 = arith.constant dense<0.000000e+00> : vector<16x128xf32>
    %15 = tpu.matmul %13, %14, %cst_11 {dimension_numbers = #tpu.dot_dimension_numbers<[1], [0], [0], [1], [0, 0, 1, 1], [], []>} : vector<16x128xbf16>, vector<128x128xbf16>, vector<16x128xf32> -> vector<16x128xf32>
    %16 = arith.addf %12, %15 : vector<16x128xf32>
    %c0_12 = arith.constant 0 : index
    %c0_13 = arith.constant 0 : index
    %17 = vector.load %arg10[%c0_12, %c0_13] : memref<16x128xf32, #tpu.memory_space<vmem>>, vector<16x128xf32>
    tpu.vector_store %arg10[%c0_12, %c0_13], %16 {strides = array<i32>} : memref<16x128xf32, #tpu.memory_space<vmem>>, vector<16x128xf32>,
    %c0_i32_14 = arith.constant 0 : i32
    %18 = arith.cmpi eq, %arg1, %c0_i32_14 : i32
    %19 = arith.extui %18 : i1 to i32
    %c0_i32_15 = arith.constant 0 : i32
    %20 = arith.cmpi ne, %19, %c0_i32_15 : i32
    scf.if %20 {
      %c0_16 = arith.constant 0 : index
      %c0_17 = arith.constant 0 : index
      %21 = vector.load %arg2[%c0_16, %c0_17] : memref<16x128xf32, #tpu.memory_space<vmem>>, vector<16x128xf32>
      %c0_18 = arith.constant 0 : index
      %c0_19 = arith.constant 0 : index
      %22 = vector.load %arg10[%c0_18, %c0_19] : memref<16x128xf32, #tpu.memory_space<vmem>>, vector<16x128xf32>
      %23 = arith.addf %21, %22 : vector<16x128xf32>
      %c0_20 = arith.constant 0 : index
      %c0_21 = arith.constant 0 : index
      %24 = vector.load %arg6[%c0_20, %c0_21] : memref<1x128xf32, #tpu.memory_space<vmem>>, vector<1x128xf32>
      %25 = vector.broadcast %24 : vector<1x128xf32> to vector<16x128xf32>
      %26 = arith.addf %23, %25 : vector<16x128xf32>
      %cst_22 = arith.constant dense<0.000000e+00> : vector<16xf32>
      %27 = vector.multi_reduction <add>, %26, %cst_22 [1] : vector<16x128xf32> to vector<16xf32>
      %28 = vector.shape_cast %27 : vector<16xf32> to vector<16x1xf32>
      %cst_23 = arith.constant 3.125000e-02 : f32
      %29 = vector.broadcast %cst_23 : f32 to vector<16x1xf32>
      %30 = arith.mulf %28, %29 : vector<16x1xf32>
      %31 = vector.broadcast %30 : vector<16x1xf32> to vector<16x128xf32>
      %32 = arith.subf %26, %31 : vector<16x128xf32>
      %33 = tpu.iota {dimensions = array<i32: 1>} : vector<16x128xi32>
      %c32_i32 = arith.constant 32 : i32
      %34 = vector.broadcast %c32_i32 : i32 to vector<16x128xi32>
      %35 = arith.cmpi slt, %33, %34 : vector<16x128xi32>
      %cst_24 = arith.constant 0.000000e+00 : f32
      %36 = vector.broadcast %cst_24 : f32 to vector<16x128xf32>
      %37 = arith.select %35, %32, %36 : vector<16x128xi1>, vector<16x128xf32>
      %38 = arith.mulf %37, %37 : vector<16x128xf32>
      %cst_25 = arith.constant dense<0.000000e+00> : vector<16xf32>
      %39 = vector.multi_reduction <add>, %38, %cst_25 [1] : vector<16x128xf32> to vector<16xf32>
      %40 = vector.shape_cast %39 : vector<16xf32> to vector<16x1xf32>
      %cst_26 = arith.constant 3.125000e-02 : f32
      %41 = vector.broadcast %cst_26 : f32 to vector<16x1xf32>
      %42 = arith.mulf %40, %41 : vector<16x1xf32>
      %cst_27 = arith.constant 9.99999974E-6 : f32
      %43 = vector.broadcast %cst_27 : f32 to vector<16x1xf32>
      %44 = arith.addf %42, %43 : vector<16x1xf32>
      %45 = math.rsqrt %44 : vector<16x1xf32>
      %46 = vector.broadcast %45 : vector<16x1xf32> to vector<16x128xf32>
      %47 = arith.mulf %37, %46 : vector<16x128xf32>
      %c0_28 = arith.constant 0 : index
      %c0_29 = arith.constant 0 : index
      %48 = vector.load %arg7[%c0_28, %c0_29] : memref<1x128xf32, #tpu.memory_space<vmem>>, vector<1x128xf32>
      %49 = vector.broadcast %48 : vector<1x128xf32> to vector<16x128xf32>
      %50 = arith.mulf %47, %49 : vector<16x128xf32>
      %c0_30 = arith.constant 0 : index
      %c0_31 = arith.constant 0 : index
      %51 = vector.load %arg8[%c0_30, %c0_31] : memref<1x128xf32, #tpu.memory_space<vmem>>, vector<1x128xf32>
      %52 = vector.broadcast %51 : vector<1x128xf32> to vector<16x128xf32>
      %53 = arith.addf %50, %52 : vector<16x128xf32>
      %c0_32 = arith.constant 0 : index
      %c0_33 = arith.constant 0 : index
      %54 = vector.load %arg9[%c0_32, %c0_33] : memref<16x128xf32, #tpu.memory_space<vmem>>, vector<16x128xf32>
      tpu.vector_store %arg9[%c0_32, %c0_33], %53 {strides = array<i32>} : memref<16x128xf32, #tpu.memory_space<vmem>>, vector<16x128xf32>,
    } else {
    }
    return
  }
  func.func @transform_0(%arg0: i32, %arg1: i32) -> (i32, i32) {
    %c0_i32 = arith.constant 0 : i32
    %c0_i32_0 = arith.constant 0 : i32
    return %arg0, %c0_i32 : i32, i32
  }
  func.func @transform_1(%arg0: i32, %arg1: i32) -> (i32, i32) {
    %c0_i32 = arith.constant 0 : i32
    %c0_i32_0 = arith.constant 0 : i32
    return %c0_i32, %arg1 : i32, i32
  }
  func.func @transform_2(%arg0: i32, %arg1: i32) -> (i32, i32) {
    %c0_i32 = arith.constant 0 : i32
    %c0_i32_0 = arith.constant 0 : i32
    return %c0_i32, %arg1 : i32, i32
  }
  func.func @transform_3(%arg0: i32, %arg1: i32) -> (i32, i32) {
    %c0_i32 = arith.constant 0 : i32
    %c0_i32_0 = arith.constant 0 : i32
    return %arg1, %c0_i32 : i32, i32
  }
  func.func @transform_4(%arg0: i32, %arg1: i32) -> (i32, i32) {
    %c0_i32 = arith.constant 0 : i32
    %c0_i32_0 = arith.constant 0 : i32
    %c0_i32_1 = arith.constant 0 : i32
    return %c0_i32, %c0_i32_0 : i32, i32
  }
  func.func @transform_5(%arg0: i32, %arg1: i32) -> (i32, i32) {
    %c0_i32 = arith.constant 0 : i32
    %c0_i32_0 = arith.constant 0 : i32
    %c0_i32_1 = arith.constant 0 : i32
    return %c0_i32, %c0_i32_0 : i32, i32
  }
  func.func @transform_6(%arg0: i32, %arg1: i32) -> (i32, i32) {
    %c0_i32 = arith.constant 0 : i32
    %c0_i32_0 = arith.constant 0 : i32
    %c0_i32_1 = arith.constant 0 : i32
    return %c0_i32, %c0_i32_0 : i32, i32
  }
  func.func @transform_7(%arg0: i32, %arg1: i32) -> (i32, i32) {
    %c0_i32 = arith.constant 0 : i32
    %c0_i32_0 = arith.constant 0 : i32
    return %arg0, %c0_i32 : i32, i32
  }
}

module attributes {stable_mosaic.version = 11 : i64} {
  func.func @ffn_kernel(%arg0: i32, %arg1: i32, %arg2: memref<16x128xf32, #tpu.memory_space<vmem>>, %arg3: memref<128x128xbf16, #tpu.memory_space<vmem>>, %arg4: memref<1x128xf32, #tpu.memory_space<vmem>>, %arg5: memref<128x128xbf16, #tpu.memory_space<vmem>>, %arg6: memref<1x128xf32, #tpu.memory_space<vmem>>, %arg7: memref<1x128xf32, #tpu.memory_space<vmem>>, %arg8: memref<1x128xf32, #tpu.memory_space<vmem>>, %arg9: memref<16x128xf32, #tpu.memory_space<vmem>>, %arg10: memref<16x128xf32, #tpu.memory_space<vmem>>) attributes {dimension_semantics = [#tpu.dimension_semantics<parallel>, #tpu.dimension_semantics<arbitrary>], iteration_bounds = array<i64: 1, 1>, scalar_prefetch = 0 : i64, scratch_operands = 1 : i64, tpu.core_type = #tpu.core_type<tc>, window_params = [{transform_indices = @transform_0, window_bounds = array<i64: 16, 128>}, {transform_indices = @transform_1, window_bounds = array<i64: 128, 128>}, {transform_indices = @transform_2, window_bounds = array<i64: 1, 128>}, {transform_indices = @transform_3, window_bounds = array<i64: 128, 128>}, {pipeline_mode = #tpu.pipeline_mode<synchronous>, transform_indices = @transform_4, window_bounds = array<i64: 1, 128>}, {pipeline_mode = #tpu.pipeline_mode<synchronous>, transform_indices = @transform_5, window_bounds = array<i64: 1, 128>}, {pipeline_mode = #tpu.pipeline_mode<synchronous>, transform_indices = @transform_6, window_bounds = array<i64: 1, 128>}, {transform_indices = @transform_7, window_bounds = array<i64: 16, 128>}]} {
    %c0_i32 = arith.constant 0 : i32
    %0 = arith.cmpi eq, %arg1, %c0_i32 : i32
    %1 = arith.extui %0 : i1 to i32
    %c0_i32_0 = arith.constant 0 : i32
    %2 = arith.cmpi ne, %1, %c0_i32_0 : i32
    scf.if %2 {
      %cst_16 = arith.constant 0.000000e+00 : f32
      %21 = vector.broadcast %cst_16 : f32 to vector<16x128xf32>
      %c0_17 = arith.constant 0 : index
      %c0_18 = arith.constant 0 : index
      %22 = vector.load %arg10[%c0_17, %c0_18] : memref<16x128xf32, #tpu.memory_space<vmem>>, vector<16x128xf32>
      tpu.vector_store %arg10[%c0_17, %c0_18], %21 {strides = array<i32>} : memref<16x128xf32, #tpu.memory_space<vmem>>, vector<16x128xf32>,
    } else {
    }
    %c0 = arith.constant 0 : index
    %c0_1 = arith.constant 0 : index
    %3 = vector.load %arg2[%c0, %c0_1] : memref<16x128xf32, #tpu.memory_space<vmem>>, vector<16x128xf32>
    %4 = arith.truncf %3 : vector<16x128xf32> to vector<16x128xbf16>
    %c0_2 = arith.constant 0 : index
    %c0_3 = arith.constant 0 : index
    %5 = vector.load %arg3[%c0_2, %c0_3] : memref<128x128xbf16, #tpu.memory_space<vmem>>, vector<128x128xbf16>
    %cst = arith.constant dense<0.000000e+00> : vector<16x128xf32>
    %6 = tpu.matmul %4, %5, %cst {dimension_numbers = #tpu.dot_dimension_numbers<[1], [0], [0], [1], [0, 0, 1, 1], [], []>} : vector<16x128xbf16>, vector<128x128xbf16>, vector<16x128xf32> -> vector<16x128xf32>
    %c0_4 = arith.constant 0 : index
    %c0_5 = arith.constant 0 : index
    %7 = vector.load %arg4[%c0_4, %c0_5] : memref<1x128xf32, #tpu.memory_space<vmem>>, vector<1x128xf32>
    %8 = vector.broadcast %7 : vector<1x128xf32> to vector<16x128xf32>
    %9 = arith.addf %6, %8 : vector<16x128xf32>
    %cst_6 = arith.constant 0.000000e+00 : f32
    %10 = vector.broadcast %cst_6 : f32 to vector<16x128xf32>
    %11 = arith.maximumf %9, %10 : vector<16x128xf32>
    %c0_7 = arith.constant 0 : index
    %c0_8 = arith.constant 0 : index
    %12 = vector.load %arg10[%c0_7, %c0_8] : memref<16x128xf32, #tpu.memory_space<vmem>>, vector<16x128xf32>
    %13 = arith.truncf %11 : vector<16x128xf32> to vector<16x128xbf16>
    %c0_9 = arith.constant 0 : index
    %c0_10 = arith.constant 0 : index
    %14 = vector.load %arg5[%c0_9, %c0_10] : memref<128x128xbf16, #tpu.memory_space<vmem>>, vector<128x128xbf16>
    %cst_11 = arith.constant dense<0.000000e+00> : vector<16x128xf32>
    %15 = tpu.matmul %13, %14, %cst_11 {dimension_numbers = #tpu.dot_dimension_numbers<[1], [0], [0], [1], [0, 0, 1, 1], [], []>} : vector<16x128xbf16>, vector<128x128xbf16>, vector<16x128xf32> -> vector<16x128xf32>
    %16 = arith.addf %12, %15 : vector<16x128xf32>
    %c0_12 = arith.constant 0 : index
    %c0_13 = arith.constant 0 : index
    %17 = vector.load %arg10[%c0_12, %c0_13] : memref<16x128xf32, #tpu.memory_space<vmem>>, vector<16x128xf32>
    tpu.vector_store %arg10[%c0_12, %c0_13], %16 {strides = array<i32>} : memref<16x128xf32, #tpu.memory_space<vmem>>, vector<16x128xf32>,
    %c0_i32_14 = arith.constant 0 : i32
    %18 = arith.cmpi eq, %arg1, %c0_i32_14 : i32
    %19 = arith.extui %18 : i1 to i32
    %c0_i32_15 = arith.constant 0 : i32
    %20 = arith.cmpi ne, %19, %c0_i32_15 : i32
    scf.if %20 {
      %c0_16 = arith.constant 0 : index
      %c0_17 = arith.constant 0 : index
      %21 = vector.load %arg2[%c0_16, %c0_17] : memref<16x128xf32, #tpu.memory_space<vmem>>, vector<16x128xf32>
      %c0_18 = arith.constant 0 : index
      %c0_19 = arith.constant 0 : index
      %22 = vector.load %arg10[%c0_18, %c0_19] : memref<16x128xf32, #tpu.memory_space<vmem>>, vector<16x128xf32>
      %23 = arith.addf %21, %22 : vector<16x128xf32>
      %c0_20 = arith.constant 0 : index
      %c0_21 = arith.constant 0 : index
      %24 = vector.load %arg6[%c0_20, %c0_21] : memref<1x128xf32, #tpu.memory_space<vmem>>, vector<1x128xf32>
      %25 = vector.broadcast %24 : vector<1x128xf32> to vector<16x128xf32>
      %26 = arith.addf %23, %25 : vector<16x128xf32>
      %cst_22 = arith.constant dense<0.000000e+00> : vector<16xf32>
      %27 = vector.multi_reduction <add>, %26, %cst_22 [1] : vector<16x128xf32> to vector<16xf32>
      %28 = vector.shape_cast %27 : vector<16xf32> to vector<16x1xf32>
      %cst_23 = arith.constant 3.125000e-02 : f32
      %29 = vector.broadcast %cst_23 : f32 to vector<16x1xf32>
      %30 = arith.mulf %28, %29 : vector<16x1xf32>
      %31 = vector.broadcast %30 : vector<16x1xf32> to vector<16x128xf32>
      %32 = arith.subf %26, %31 : vector<16x128xf32>
      %33 = tpu.iota {dimensions = array<i32: 1>} : vector<16x128xi32>
      %c32_i32 = arith.constant 32 : i32
      %34 = vector.broadcast %c32_i32 : i32 to vector<16x128xi32>
      %35 = arith.cmpi slt, %33, %34 : vector<16x128xi32>
      %cst_24 = arith.constant 0.000000e+00 : f32
      %36 = vector.broadcast %cst_24 : f32 to vector<16x128xf32>
      %37 = arith.select %35, %32, %36 : vector<16x128xi1>, vector<16x128xf32>
      %38 = arith.mulf %37, %37 : vector<16x128xf32>
      %cst_25 = arith.constant dense<0.000000e+00> : vector<16xf32>
      %39 = vector.multi_reduction <add>, %38, %cst_25 [1] : vector<16x128xf32> to vector<16xf32>
      %40 = vector.shape_cast %39 : vector<16xf32> to vector<16x1xf32>
      %cst_26 = arith.constant 3.125000e-02 : f32
      %41 = vector.broadcast %cst_26 : f32 to vector<16x1xf32>
      %42 = arith.mulf %40, %41 : vector<16x1xf32>
      %cst_27 = arith.constant 9.99999974E-6 : f32
      %43 = vector.broadcast %cst_27 : f32 to vector<16x1xf32>
      %44 = arith.addf %42, %43 : vector<16x1xf32>
      %45 = math.rsqrt %44 : vector<16x1xf32>
      %46 = vector.broadcast %45 : vector<16x1xf32> to vector<16x128xf32>
      %47 = arith.mulf %37, %46 : vector<16x128xf32>
      %c0_28 = arith.constant 0 : index
      %c0_29 = arith.constant 0 : index
      %48 = vector.load %arg7[%c0_28, %c0_29] : memref<1x128xf32, #tpu.memory_space<vmem>>, vector<1x128xf32>
      %49 = vector.broadcast %48 : vector<1x128xf32> to vector<16x128xf32>
      %50 = arith.mulf %47, %49 : vector<16x128xf32>
      %c0_30 = arith.constant 0 : index
      %c0_31 = arith.constant 0 : index
      %51 = vector.load %arg8[%c0_30, %c0_31] : memref<1x128xf32, #tpu.memory_space<vmem>>, vector<1x128xf32>
      %52 = vector.broadcast %51 : vector<1x128xf32> to vector<16x128xf32>
      %53 = arith.addf %50, %52 : vector<16x128xf32>
      %c0_32 = arith.constant 0 : index
      %c0_33 = arith.constant 0 : index
      %54 = vector.load %arg9[%c0_32, %c0_33] : memref<16x128xf32, #tpu.memory_space<vmem>>, vector<16x128xf32>
      tpu.vector_store %arg9[%c0_32, %c0_33], %53 {strides = array<i32>} : memref<16x128xf32, #tpu.memory_space<vmem>>, vector<16x128xf32>,
    } else {
    }
    return
  }
  func.func @transform_0(%arg0: i32, %arg1: i32) -> (i32, i32) {
    %c0_i32 = arith.constant 0 : i32
    %c0_i32_0 = arith.constant 0 : i32
    return %arg0, %c0_i32 : i32, i32
  }
  func.func @transform_1(%arg0: i32, %arg1: i32) -> (i32, i32) {
    %c0_i32 = arith.constant 0 : i32
    %c0_i32_0 = arith.constant 0 : i32
    return %c0_i32, %arg1 : i32, i32
  }
  func.func @transform_2(%arg0: i32, %arg1: i32) -> (i32, i32) {
    %c0_i32 = arith.constant 0 : i32
    %c0_i32_0 = arith.constant 0 : i32
    return %c0_i32, %arg1 : i32, i32
  }
  func.func @transform_3(%arg0: i32, %arg1: i32) -> (i32, i32) {
    %c0_i32 = arith.constant 0 : i32
    %c0_i32_0 = arith.constant 0 : i32
    return %arg1, %c0_i32 : i32, i32
  }
  func.func @transform_4(%arg0: i32, %arg1: i32) -> (i32, i32) {
    %c0_i32 = arith.constant 0 : i32
    %c0_i32_0 = arith.constant 0 : i32
    %c0_i32_1 = arith.constant 0 : i32
    return %c0_i32, %c0_i32_0 : i32, i32
  }
  func.func @transform_5(%arg0: i32, %arg1: i32) -> (i32, i32) {
    %c0_i32 = arith.constant 0 : i32
    %c0_i32_0 = arith.constant 0 : i32
    %c0_i32_1 = arith.constant 0 : i32
    return %c0_i32, %c0_i32_0 : i32, i32
  }
  func.func @transform_6(%arg0: i32, %arg1: i32) -> (i32, i32) {
    %c0_i32 = arith.constant 0 : i32
    %c0_i32_0 = arith.constant 0 : i32
    %c0_i32_1 = arith.constant 0 : i32
    return %c0_i32, %c0_i32_0 : i32, i32
  }
  func.func @transform_7(%arg0: i32, %arg1: i32) -> (i32, i32) {
    %c0_i32 = arith.constant 0 : i32
    %c0_i32_0 = arith.constant 0 : i32
    return %arg0, %c0_i32 : i32, i32
  }
}

</mosaic_0001>

<bundles_post_ra>
// kernel: _ffn_impl.1
= control target key start
LH: loop header
LB: loop body
LE: loop exit
PB: predicated region body
PF: predicated region fallthrough
CT: control target
= control target key end

     0   :  { %12 = vsyncpa [#allocation4], 0  ;;  %s578_s0 = inlined_call_operand.vmem [shape: f32[16,128], index: 0, kind: input, shape index: {}]   ;;  %s579_s1 = inlined_call_operand.hbm [shape: bf16[128,128], index: 1, kind: input, shape index: {}]   ;;  %s580_s2 = inlined_call_operand.vmem [shape: f32[1,128], index: 2, kind: input, shape index: {}]   ;;  %s581_s3 = inlined_call_operand.hbm [shape: bf16[128,128], index: 3, kind: input, shape index: {}]   ;;  %s582_s4 = inlined_call_operand.vmem [shape: f32[1,128], index: 4, kind: input, shape index: {}]   ;;  %s583_s5 = inlined_call_operand.vmem [shape: f32[1,128], index: 5, kind: input, shape index: {}]   ;;  %s584_s6 = inlined_call_operand.vmem [shape: f32[1,128], index: 6, kind: input, shape index: {}]   ;;  %s585_s7 = inlined_call_operand.hbm [shape: f32[16,128], index: 7, kind: output, shape index: {}]  }
   0x1   :  { %13 = vsyncpa [#allocation7], 0 }
   0x2   :  { %14 = vsyncpa [#allocation5], 0  ;;  %s21_s26 = sshll.u32 %s579_s1, 4  ;;  %s504_s27 = smov [#allocation3]   ;;  %s22_s26 = int_to_ptr.hbm [resolvable:$true] %s21_s26 }
   0x3   :  { %s23_s28 = sshll.u32 %s504_s27, 4  ;;  %s36_s8 = sshll.u32 %s581_s3, 4  ;;  %s24_s28 = int_to_ptr.vmem [resolvable:$true] %s23_s28  ;;  %s37_s8 = int_to_ptr.hbm [resolvable:$true] %s36_s8 }
   0x4   :  { %s505_s9 = smov 64   ;;  %s506_s10 = smov 4  }
   0x5   :  { %29 = dma.hbm_to_vmem [thread:$0]  %s22_s26, 1024, %s24_s28, [#allocation4], %s505_s9, %s505_s9, %s506_s10  }
   0x6   :  { %s507_s11 = smov [#allocation6]  }
   0x7   :  { %s38_s12 = sshll.u32 %s507_s11, 4  ;;  %s39_s12 = int_to_ptr.vmem [resolvable:$true] %s38_s12 }
   0x8   :  { %44 = dma.hbm_to_vmem [thread:$0]  %s37_s8, 1024, %s39_s12, [#allocation7], %s505_s9, %s505_s9, %s506_s10  }
   0x9   :  { %498 = dma.done.wait [#allocation4], 1024  }
   0xa   :  { %499 = vsyncadd [#allocation4], 4294966272 }
   0xb   :  { %500 = dma.done.wait [#allocation7], 1024  }
   0xc   :  { %501 = vsyncadd [#allocation7], 4294966272  ;;  %v402_v0 = vld [vmem:[#allocation3 + $0x38] sm:$0xff]  ;;  %v401_v1 = vld [vmem:[#allocation3 + $0x30] sm:$0xff]  ;;  %v260_v34 = vlaneseq  ;;  %s317_s23 = sshll.u32 %s585_s7, 4  ;;  %s510_s24 = smov 8   ;;  %s318_s23 = int_to_ptr.hbm [resolvable:$true] %s317_s23 }
   0xd   :  { %136 = vmatpush.bf16.msra.mxu0 %v402_v0  ;;  %v410_v2 = vld [vmem:[#allocation6 + $0x38] sm:$0xff]  ;;  %v409_v3 = vld [vmem:[#allocation6 + $0x30] sm:$0xff]  ;;  %v400_v4 = vld [vmem:[#allocation3 + $0x28] sm:$0xff] }
   0xe   :  { %219 = vmatpush.bf16.msra.mxu1 %v410_v2  ;;  %v408_v5 = vld [vmem:[#allocation6 + $0x28] sm:$0xff]  ;;  %v399_v6 = vld [vmem:[#allocation3 + $0x20] sm:$0xff]  ;;  %v398_v8 = vld [vmem:[#allocation3 + $0x18] sm:$0xff]  ;;  %v261_v35 = vand.u32 127, %v260_v34 }
   0xf   :  { %v407_v7 = vld [vmem:[#allocation6 + $0x20] sm:$0xff]  ;;  %v397_v9 = vld [vmem:[#allocation3 + $0x10] sm:$0xff]  ;;  %v396_v10 = vld [vmem:[#allocation3 + $0x8] sm:$0xff] }
  0x10   :  { %v395_v11 = vld [vmem:[#allocation3] sm:$0xff]  ;;  %v66_v13 = vld [vmem:[%s578_s0 + $0x8] sm:$0xff]  ;;  %v406_v15 = vld [vmem:[#allocation6 + $0x18] sm:$0xff]  ;;  %vm262_vm0 = vcmp.lt.s32.totalorder %v261_v35, 32 }
  0x11   :  { %137 = vmatpush.bf16.msra.mxu0 %v401_v1  ;;  %v65_v12 = vld [vmem:[%s578_s0] sm:$0xff]  ;;  %v405_v16 = vld [vmem:[#allocation6 + $0x10] sm:$0xff]  ;;  %v404_v17 = vld [vmem:[#allocation6 + $0x8] sm:$0xff] }
  0x12   :  { %220 = vmatpush.bf16.msra.mxu1 %v409_v3  ;;  %v67_v14 = vpack.c.bf16 %v66_v13, %v65_v12  ;;  %v403_v18 = vld [vmem:[#allocation6] sm:$0xff] }
  0x13   :  { %v418_v20 = vld [vmem:[%s580_s2] ss:$0 sm:$0xff] }
  0x14   :  { %v419_v27 = vld [vmem:[%s582_s4] ss:$0 sm:$0xff] }
  0x15   :  { %138 = vmatpush.bf16.msra.mxu0 %v400_v4  ;;  %v420_v60 = vld [vmem:[%s583_s5] ss:$0 sm:$0xff]  ;;  %s508_s5 = smov [#allocation8]  }
  0x16   :  { %221 = vmatpush.bf16.msra.mxu1 %v408_v5  ;;  %v421_v0 = vld [vmem:[%s584_s6] ss:$0 sm:$0xff]  ;;  %s315_s20 = sshll.u32 %s508_s5, 4  ;;  %s509_s6 = smov 128   ;;  %s316_s20 = int_to_ptr.vmem [resolvable:$true] %s315_s20 }
  0x19   :  { %139 = vmatpush.bf16.msra.mxu0 %v399_v6 }
  0x1a   :  { %222 = vmatpush.bf16.msra.mxu1 %v407_v7 }
  0x1d   :  { %140 = vmatpush.bf16.msra.mxu0 %v398_v8 }
  0x1e   :  { %223 = vmatpush.bf16.msra.mxu1 %v406_v15 }
  0x21   :  { %141 = vmatpush.bf16.msra.mxu0 %v397_v9 }
  0x22   :  { %224 = vmatpush.bf16.msra.mxu1 %v405_v16 }
  0x25   :  { %142 = vmatpush.bf16.msra.mxu0 %v396_v10 }
  0x26   :  { %225 = vmatpush.bf16.msra.mxu1 %v404_v17 }
  0x29   :  { %143 = vmatpush.bf16.msra.mxu0 %v395_v11 }
  0x2a   :  { %226 = vmatpush.bf16.msra.mxu1 %v403_v18 }
  0x2c   :  { %144 = vmatmul.bf16.vlgmr.msra.gmra.mxu0 %v67_v14 }
  0xa9   :  { %v145_v19 = vpop.f32.mrf.mxu0 }
  0xaa   :  { %v146_v21 = vadd.f32 %v418_v20, %v145_v19 }
  0xac   :  { %v150_v24 = vmax.f32 %v146_v21, 0.0 }
  0xb1   :  { %v147_v22 = vpop.f32.mrf.mxu0 }
  0xb2   :  { %v148_v23 = vadd.f32 %v418_v20, %v147_v22 }
  0xb4   :  { %v151_v25 = vmax.f32 %v148_v23, 0.0 }
  0xb6   :  { %v154_v26 = vpack.c.bf16 %v151_v25, %v150_v24 }
  0xb8   :  { %227 = vmatmul.bf16.vlgmr.msra.gmra.mxu1 %v154_v26 }
 0x135   :  { %v228_v28 = vpop.f32.mrf.mxu1 }
 0x136   :  { %v244_v29 = vadd.f32 %v228_v28, %v65_v12 }
 0x138   :  { %v250_v30 = vadd.f32 %v419_v27, %v244_v29 }
 0x13a   :  { %252 = vadd.xlane.f32.xlu0 %v250_v30 }
 0x13d   :  { %v230_v31 = vpop.f32.mrf.mxu1 }
 0x13e   :  { %v245_v32 = vadd.f32 %v230_v31, %v66_v13 }
 0x140   :  { %v251_v33 = vadd.f32 %v419_v27, %v245_v32 }
 0x142   :  { %254 = vadd.xlane.f32.xlu0 %v251_v33 }
 0x1ad   :  { %v253_v36 = vpop.xlane.xlu0 %252 }
 0x1ae   :  { %v256_v37 = vmul.f32 0.03125, %v253_v36 }
 0x1b0   :  { %v258_v38 = vsub.f32 %v250_v30, %v256_v37 }
 0x1b2   :  { %v263_v39 = vsel %vm262_vm0, %v258_v38, 0.0 }
 0x1b3   :  { %v265_v40 = vmul.f32 %v263_v39, %v263_v39 }
 0x1b5   :  { %267 = vadd.xlane.f32.xlu1 %v265_v40  ;;  %v255_v41 = vpop.xlane.xlu0 %254 }
 0x1b6   :  { %v257_v42 = vmul.f32 0.03125, %v255_v41 }
 0x1b8   :  { %v259_v43 = vsub.f32 %v251_v33, %v257_v42 }
 0x1ba   :  { %v264_v44 = vsel %vm262_vm0, %v259_v43, 0.0 }
 0x1bb   :  { %v266_v45 = vmul.f32 %v264_v44, %v264_v44 }
 0x1bd   :  { %269 = vadd.xlane.f32.xlu1 %v266_v45 }
 0x228   :  { %v268_v46 = vpop.xlane.xlu1 %267 }
 0x229   :  { %v271_v47 = vmul.f32 0.03125, %v268_v46 }
 0x22b   :  { %v273_v48 = vadd.f32 1e-05, %v271_v47 }
 0x22d   :  { %422 = vrsqrt.f32 %v273_v48  ;;  %vm281_vm2 = vweird.f32 %v273_v48 }
 0x230   :  { %v270_v49 = vpop.xlane.xlu1 %269 }
 0x231   :  { %v272_v50 = vmul.f32 0.03125, %v270_v49 }
 0x233   :  { %v423_v51 = vpop.eup %422  ;;  %v274_v52 = vadd.f32 1e-05, %v272_v50 }
 0x234   :  { %v276_v53 = vmul.f32 %v423_v51, %v273_v48  ;;  %vm282_vm1 = vweird.f32 %v423_v51 }
 0x235   :  { %424 = vrsqrt.f32 %v274_v52  ;;  %vm283_vm3 = vmor %vm281_vm2, %vm282_vm1  ;;  %vm291_vm5 = vweird.f32 %v274_v52 }
 0x236   :  { %v277_v54 = vmul.f32 %v423_v51, %v276_v53 }
 0x238   :  { %v278_v55 = vmul.f32 0.5, %v277_v54 }
 0x23a   :  { %v279_v56 = vsub.f32 1.5, %v278_v55 }
 0x23b   :  { %v425_v57 = vpop.eup %424 }
 0x23c   :  { %v280_v58 = vmul.f32 %v423_v51, %v279_v56  ;;  %v286_v59 = vmul.f32 %v425_v57, %v274_v52  ;;  %vm292_vm4 = vweird.f32 %v425_v57 }
 0x23d   :  { %vm293_vm6 = vmor %vm291_vm5, %vm292_vm4 }
 0x23e   :  { %v284_v61 = vsel %vm283_vm3, %v423_v51, %v280_v58  ;;  %v287_v62 = vmul.f32 %v425_v57, %v286_v59 }
 0x23f   :  { %v295_v63 = vmul.f32 %v284_v61, %v263_v39 }
 0x240   :  { %v288_v1 = vmul.f32 0.5, %v287_v62 }
 0x241   :  { %v301_v2 = vmul.f32 %v420_v60, %v295_v63 }
 0x242   :  { %v289_v3 = vsub.f32 1.5, %v288_v1 }
 0x243   :  { %v307_v4 = vadd.f32 %v421_v0, %v301_v2 }
 0x244   :  { %v290_v5 = vmul.f32 %v425_v57, %v289_v3 }
 0x245   :  { %309 = vst [vmem:[#allocation8] sm:$0xff] %v307_v4 }
 0x246   :  { %v294_v6 = vsel %vm293_vm6, %v425_v57, %v290_v5 }
 0x247   :  { %v296_v7 = vmul.f32 %v294_v6, %v264_v44 }
 0x249   :  { %v302_v8 = vmul.f32 %v420_v60, %v296_v7 }
 0x24b   :  { %v308_v9 = vadd.f32 %v421_v0, %v302_v8 }
 0x24d   :  { %310 = vst [vmem:[#allocation8 + $0x8] sm:$0xff] %v308_v9 }
 0x24e   :  { %323 = dma.vmem_to_hbm [thread:$0]  %s316_s20, 256, %s318_s23, [#allocation5], %s509_s6, %s509_s6, %s510_s24  }
 0x24f   :  { %502 = dma.done.wait [#allocation5], 256  }
 0x250   :  { %503 = vsyncadd [#allocation5], 4294967040 }
 0x251   :  { %328 = vsyncpa [#allocation4], 1 }
 0x252   :  { %329 = vsyncpa [#allocation7], 1 }
 0x253   :  { %330 = vsyncpa [#allocation5], 1 }

// kernel: _ffn_impl.1
= control target key start
LH: loop header
LB: loop body
LE: loop exit
PB: predicated region body
PF: predicated region fallthrough
CT: control target
= control target key end

     0   :  { %12 = vsyncpa [#allocation4], 0  ;;  %s578_s0 = inlined_call_operand.vmem [shape: f32[16,128], index: 0, kind: input, shape index: {}]   ;;  %s579_s1 = inlined_call_operand.hbm [shape: bf16[128,128], index: 1, kind: input, shape index: {}]   ;;  %s580_s2 = inlined_call_operand.vmem [shape: f32[1,128], index: 2, kind: input, shape index: {}]   ;;  %s581_s3 = inlined_call_operand.hbm [shape: bf16[128,128], index: 3, kind: input, shape index: {}]   ;;  %s582_s4 = inlined_call_operand.vmem [shape: f32[1,128], index: 4, kind: input, shape index: {}]   ;;  %s583_s5 = inlined_call_operand.vmem [shape: f32[1,128], index: 5, kind: input, shape index: {}]   ;;  %s584_s6 = inlined_call_operand.vmem [shape: f32[1,128], index: 6, kind: input, shape index: {}]   ;;  %s585_s7 = inlined_call_operand.hbm [shape: f32[16,128], index: 7, kind: output, shape index: {}]  }
   0x1   :  { %13 = vsyncpa [#allocation7], 0 }
   0x2   :  { %14 = vsyncpa [#allocation5], 0  ;;  %s21_s26 = sshll.u32 %s579_s1, 4  ;;  %s504_s27 = smov [#allocation3]   ;;  %s22_s26 = int_to_ptr.hbm [resolvable:$true] %s21_s26 }
   0x3   :  { %s23_s28 = sshll.u32 %s504_s27, 4  ;;  %s36_s8 = sshll.u32 %s581_s3, 4  ;;  %s24_s28 = int_to_ptr.vmem [resolvable:$true] %s23_s28  ;;  %s37_s8 = int_to_ptr.hbm [resolvable:$true] %s36_s8 }
   0x4   :  { %s505_s9 = smov 64   ;;  %s506_s10 = smov 4  }
   0x5   :  { %29 = dma.hbm_to_vmem [thread:$0]  %s22_s26, 1024, %s24_s28, [#allocation4], %s505_s9, %s505_s9, %s506_s10  }
   0x6   :  { %s507_s11 = smov [#allocation6]  }
   0x7   :  { %s38_s12 = sshll.u32 %s507_s11, 4  ;;  %s39_s12 = int_to_ptr.vmem [resolvable:$true] %s38_s12 }
   0x8   :  { %44 = dma.hbm_to_vmem [thread:$0]  %s37_s8, 1024, %s39_s12, [#allocation7], %s505_s9, %s505_s9, %s506_s10  }
   0x9   :  { %498 = dma.done.wait [#allocation4], 1024  }
   0xa   :  { %499 = vsyncadd [#allocation4], 4294966272 }
   0xb   :  { %500 = dma.done.wait [#allocation7], 1024  }
   0xc   :  { %501 = vsyncadd [#allocation7], 4294966272  ;;  %v402_v0 = vld [vmem:[#allocation3 + $0x38] sm:$0xff]  ;;  %v401_v1 = vld [vmem:[#allocation3 + $0x30] sm:$0xff]  ;;  %v260_v34 = vlaneseq  ;;  %s317_s23 = sshll.u32 %s585_s7, 4  ;;  %s510_s24 = smov 8   ;;  %s318_s23 = int_to_ptr.hbm [resolvable:$true] %s317_s23 }
   0xd   :  { %136 = vmatpush.bf16.msra.mxu0 %v402_v0  ;;  %v410_v2 = vld [vmem:[#allocation6 + $0x38] sm:$0xff]  ;;  %v409_v3 = vld [vmem:[#allocation6 + $0x30] sm:$0xff]  ;;  %v400_v4 = vld [vmem:[#allocation3 + $0x28] sm:$0xff] }
   0xe   :  { %219 = vmatpush.bf16.msra.mxu1 %v410_v2  ;;  %v408_v5 = vld [vmem:[#allocation6 + $0x28] sm:$0xff]  ;;  %v399_v6 = vld [vmem:[#allocation3 + $0x20] sm:$0xff]  ;;  %v398_v8 = vld [vmem:[#allocation3 + $0x18] sm:$0xff]  ;;  %v261_v35 = vand.u32 127, %v260_v34 }
   0xf   :  { %v407_v7 = vld [vmem:[#allocation6 + $0x20] sm:$0xff]  ;;  %v397_v9 = vld [vmem:[#allocation3 + $0x10] sm:$0xff]  ;;  %v396_v10 = vld [vmem:[#allocation3 + $0x8] sm:$0xff] }
  0x10   :  { %v395_v11 = vld [vmem:[#allocation3] sm:$0xff]  ;;  %v66_v13 = vld [vmem:[%s578_s0 + $0x8] sm:$0xff]  ;;  %v406_v15 = vld [vmem:[#allocation6 + $0x18] sm:$0xff]  ;;  %vm262_vm0 = vcmp.lt.s32.totalorder %v261_v35, 32 }
  0x11   :  { %137 = vmatpush.bf16.msra.mxu0 %v401_v1  ;;  %v65_v12 = vld [vmem:[%s578_s0] sm:$0xff]  ;;  %v405_v16 = vld [vmem:[#allocation6 + $0x10] sm:$0xff]  ;;  %v404_v17 = vld [vmem:[#allocation6 + $0x8] sm:$0xff] }
  0x12   :  { %220 = vmatpush.bf16.msra.mxu1 %v409_v3  ;;  %v67_v14 = vpack.c.bf16 %v66_v13, %v65_v12  ;;  %v403_v18 = vld [vmem:[#allocation6] sm:$0xff] }
  0x13   :  { %v418_v20 = vld [vmem:[%s580_s2] ss:$0 sm:$0xff] }
  0x14   :  { %v419_v27 = vld [vmem:[%s582_s4] ss:$0 sm:$0xff] }
  0x15   :  { %138 = vmatpush.bf16.msra.mxu0 %v400_v4  ;;  %v420_v60 = vld [vmem:[%s583_s5] ss:$0 sm:$0xff]  ;;  %s508_s5 = smov [#allocation8]  }
  0x16   :  { %221 = vmatpush.bf16.msra.mxu1 %v408_v5  ;;  %v421_v0 = vld [vmem:[%s584_s6] ss:$0 sm:$0xff]  ;;  %s315_s20 = sshll.u32 %s508_s5, 4  ;;  %s509_s6 = smov 128   ;;  %s316_s20 = int_to_ptr.vmem [resolvable:$true] %s315_s20 }
  0x19   :  { %139 = vmatpush.bf16.msra.mxu0 %v399_v6 }
  0x1a   :  { %222 = vmatpush.bf16.msra.mxu1 %v407_v7 }
  0x1d   :  { %140 = vmatpush.bf16.msra.mxu0 %v398_v8 }
  0x1e   :  { %223 = vmatpush.bf16.msra.mxu1 %v406_v15 }
  0x21   :  { %141 = vmatpush.bf16.msra.mxu0 %v397_v9 }
  0x22   :  { %224 = vmatpush.bf16.msra.mxu1 %v405_v16 }
  0x25   :  { %142 = vmatpush.bf16.msra.mxu0 %v396_v10 }
  0x26   :  { %225 = vmatpush.bf16.msra.mxu1 %v404_v17 }
  0x29   :  { %143 = vmatpush.bf16.msra.mxu0 %v395_v11 }
  0x2a   :  { %226 = vmatpush.bf16.msra.mxu1 %v403_v18 }
  0x2c   :  { %144 = vmatmul.bf16.vlgmr.msra.gmra.mxu0 %v67_v14 }
  0xa9   :  { %v145_v19 = vpop.f32.mrf.mxu0 }
  0xaa   :  { %v146_v21 = vadd.f32 %v418_v20, %v145_v19 }
  0xac   :  { %v150_v24 = vmax.f32 %v146_v21, 0.0 }
  0xb1   :  { %v147_v22 = vpop.f32.mrf.mxu0 }
  0xb2   :  { %v148_v23 = vadd.f32 %v418_v20, %v147_v22 }
  0xb4   :  { %v151_v25 = vmax.f32 %v148_v23, 0.0 }
  0xb6   :  { %v154_v26 = vpack.c.bf16 %v151_v25, %v150_v24 }
  0xb8   :  { %227 = vmatmul.bf16.vlgmr.msra.gmra.mxu1 %v154_v26 }
 0x135   :  { %v228_v28 = vpop.f32.mrf.mxu1 }
 0x136   :  { %v244_v29 = vadd.f32 %v228_v28, %v65_v12 }
 0x138   :  { %v250_v30 = vadd.f32 %v419_v27, %v244_v29 }
 0x13a   :  { %252 = vadd.xlane.f32.xlu0 %v250_v30 }
 0x13d   :  { %v230_v31 = vpop.f32.mrf.mxu1 }
 0x13e   :  { %v245_v32 = vadd.f32 %v230_v31, %v66_v13 }
 0x140   :  { %v251_v33 = vadd.f32 %v419_v27, %v245_v32 }
 0x142   :  { %254 = vadd.xlane.f32.xlu0 %v251_v33 }
 0x1ad   :  { %v253_v36 = vpop.xlane.xlu0 %252 }
 0x1ae   :  { %v256_v37 = vmul.f32 0.03125, %v253_v36 }
 0x1b0   :  { %v258_v38 = vsub.f32 %v250_v30, %v256_v37 }
 0x1b2   :  { %v263_v39 = vsel %vm262_vm0, %v258_v38, 0.0 }
 0x1b3   :  { %v265_v40 = vmul.f32 %v263_v39, %v263_v39 }
 0x1b5   :  { %267 = vadd.xlane.f32.xlu1 %v265_v40  ;;  %v255_v41 = vpop.xlane.xlu0 %254 }
 0x1b6   :  { %v257_v42 = vmul.f32 0.03125, %v255_v41 }
 0x1b8   :  { %v259_v43 = vsub.f32 %v251_v33, %v257_v42 }
 0x1ba   :  { %v264_v44 = vsel %vm262_vm0, %v259_v43, 0.0 }
 0x1bb   :  { %v266_v45 = vmul.f32 %v264_v44, %v264_v44 }
 0x1bd   :  { %269 = vadd.xlane.f32.xlu1 %v266_v45 }
 0x228   :  { %v268_v46 = vpop.xlane.xlu1 %267 }
 0x229   :  { %v271_v47 = vmul.f32 0.03125, %v268_v46 }
 0x22b   :  { %v273_v48 = vadd.f32 1e-05, %v271_v47 }
 0x22d   :  { %422 = vrsqrt.f32 %v273_v48  ;;  %vm281_vm2 = vweird.f32 %v273_v48 }
 0x230   :  { %v270_v49 = vpop.xlane.xlu1 %269 }
 0x231   :  { %v272_v50 = vmul.f32 0.03125, %v270_v49 }
 0x233   :  { %v423_v51 = vpop.eup %422  ;;  %v274_v52 = vadd.f32 1e-05, %v272_v50 }
 0x234   :  { %v276_v53 = vmul.f32 %v423_v51, %v273_v48  ;;  %vm282_vm1 = vweird.f32 %v423_v51 }
 0x235   :  { %424 = vrsqrt.f32 %v274_v52  ;;  %vm283_vm3 = vmor %vm281_vm2, %vm282_vm1  ;;  %vm291_vm5 = vweird.f32 %v274_v52 }
 0x236   :  { %v277_v54 = vmul.f32 %v423_v51, %v276_v53 }
 0x238   :  { %v278_v55 = vmul.f32 0.5, %v277_v54 }
 0x23a   :  { %v279_v56 = vsub.f32 1.5, %v278_v55 }
 0x23b   :  { %v425_v57 = vpop.eup %424 }
 0x23c   :  { %v280_v58 = vmul.f32 %v423_v51, %v279_v56  ;;  %v286_v59 = vmul.f32 %v425_v57, %v274_v52  ;;  %vm292_vm4 = vweird.f32 %v425_v57 }
 0x23d   :  { %vm293_vm6 = vmor %vm291_vm5, %vm292_vm4 }
 0x23e   :  { %v284_v61 = vsel %vm283_vm3, %v423_v51, %v280_v58  ;;  %v287_v62 = vmul.f32 %v425_v57, %v286_v59 }
 0x23f   :  { %v295_v63 = vmul.f32 %v284_v61, %v263_v39 }
 0x240   :  { %v288_v1 = vmul.f32 0.5, %v287_v62 }
 0x241   :  { %v301_v2 = vmul.f32 %v420_v60, %v295_v63 }
 0x242   :  { %v289_v3 = vsub.f32 1.5, %v288_v1 }
 0x243   :  { %v307_v4 = vadd.f32 %v421_v0, %v301_v2 }
 0x244   :  { %v290_v5 = vmul.f32 %v425_v57, %v289_v3 }
 0x245   :  { %309 = vst [vmem:[#allocation8] sm:$0xff] %v307_v4 }
 0x246   :  { %v294_v6 = vsel %vm293_vm6, %v425_v57, %v290_v5 }
 0x247   :  { %v296_v7 = vmul.f32 %v294_v6, %v264_v44 }
 0x249   :  { %v302_v8 = vmul.f32 %v420_v60, %v296_v7 }
 0x24b   :  { %v308_v9 = vadd.f32 %v421_v0, %v302_v8 }
 0x24d   :  { %310 = vst [vmem:[#allocation8 + $0x8] sm:$0xff] %v308_v9 }
 0x24e   :  { %323 = dma.vmem_to_hbm [thread:$0]  %s316_s20, 256, %s318_s23, [#allocation5], %s509_s6, %s509_s6, %s510_s24  }
 0x24f   :  { %502 = dma.done.wait [#allocation5], 256  }
 0x250   :  { %503 = vsyncadd [#allocation5], 4294967040 }
 0x251   :  { %328 = vsyncpa [#allocation4], 1 }
 0x252   :  { %329 = vsyncpa [#allocation7], 1 }
 0x253   :  { %330 = vsyncpa [#allocation5], 1 }

</bundles_post_ra>
